<compile_context>
chip_gen: v7x
topology: tpu7x:2x2x1
jax: 0.10.0
libtpu: 0.0.40
codegen_flags: <defaults>
</compile_context>

<pallas_src>
import math
import functools

import jax
import jax.numpy as jnp
from jax.experimental import pallas as pl
from jax.experimental.pallas import tpu as pltpu


# ---------------------------------------------------------------------------
# Parameter / buffer setup (deterministic, mirrors the PyTorch __init__)
# ---------------------------------------------------------------------------
def make_positional_encoding(d_model: int, max_len: int = 100) -> jnp.ndarray:
    """Build the sinusoidal pe buffer, shape (max_len, d_model), float32."""
    position = jnp.arange(0, max_len, dtype=jnp.float32)[:, None]            # (max_len, 1)
    div_term = jnp.exp(
        jnp.arange(0, d_model, 2, dtype=jnp.float32) * (-math.log(10000.0) / d_model)
    )                                                                        # (d_model//2,)
    angles = position * div_term                                             # (max_len, d_model//2)
    pe = jnp.zeros((max_len, d_model), dtype=jnp.float32)
    pe = pe.at[:, 0::2].set(jnp.sin(angles))
    pe = pe.at[:, 1::2].set(jnp.cos(angles))
    return pe


# ---------------------------------------------------------------------------
# Kernels (operate on the lane-dense 2D (B, L*D) view)
# ---------------------------------------------------------------------------
def _pos_dec_eval_kernel(x_ref, pe_ref, o_ref):
    # eval-mode forward: out = x - pe (dropout is identity in eval)
    o_ref[...] = x_ref[...] - pe_ref[...]


def _pos_dec_train_prng_kernel(seed_ref, x_ref, pe_ref, o_ref, *, threshold, scale):
    # training-mode forward with on-chip dropout-mask generation:
    # keep element iff uint32 random bits >= floor(p * 2^32); scale folded in.
    pltpu.prng_seed(seed_ref[0], pl.program_id(0), pl.program_id(1))
    bits = pltpu.bitcast(pltpu.prng_random_bits(x_ref.shape), jnp.uint32)
    y = x_ref[...] - pe_ref[...]
    keep = bits >= jnp.uint32(threshold)            # P(keep) = 1 - p  (to 2^-32)
    o_ref[...] = jnp.where(keep, y * jnp.asarray(scale, y.dtype), jnp.zeros_like(y))


def _pos_dec_train_bits_kernel(x_ref, pe_ref, bits_ref, o_ref, *, threshold, scale):
    # fallback training path: host-generated uint8 bits (1 B/elem, not 4 B/elem)
    y = x_ref[...] - pe_ref[...]
    keep = bits_ref[...] >= jnp.uint8(threshold)    # P(keep) = 1 - p  (to 1/256)
    o_ref[...] = jnp.where(keep, y * jnp.asarray(scale, y.dtype), jnp.zeros_like(y))


# ---------------------------------------------------------------------------
# Tiling helper
# ---------------------------------------------------------------------------
def _choose_tiles(B, LD, itemsize, budget_bytes=2 * 1024 * 1024):
    """Pick (row, column) block sizes for the flattened (B, L*D) view."""
    sub = max(8, 32 // itemsize)                    # sublane pack: 8 f32 / 16 bf16 / 32 i8
    # Column tile: full LD when it fits the budget at `sub` rows (or when LD is
    # not 128-divisible, where full extent is the only legal block); otherwise
    # a 128-multiple chunk so huge L*D never blows the scoped VMEM limit.
    if LD * itemsize * sub <= budget_bytes or LD % 128 != 0:
        tc = LD
    else:
        tc = (budget_bytes // (itemsize * sub)) // 128 * 128
        tc = int(min(max(tc, 128), LD))
    # Row tile: as many rows as fit the budget, sublane-aligned.
    tb = max(sub, budget_bytes // max(tc * itemsize, 1))
    tb = int(min(B, tb))
    if tb < B:
        tb = max(sub, (tb // sub) * sub)
    # Keep a handful of grid steps when possible so both v7x TensorCores stream.
    if pl.cdiv(B, tb) * pl.cdiv(LD, tc) < 4 and tb > sub:
        tb = int(min(B, max(sub, ((-(-B // 4)) + sub - 1) // sub * sub)))
    return tb, tc


# ---------------------------------------------------------------------------
# Wrapper
# ---------------------------------------------------------------------------
def positional_decoding(x, pe, *, dropout_p=0.1, training=False, key=None):
    """x: (B, L, D), pe: (max_len, D).  Returns dropout(x - pe[None, :L, :])."""
    B, L, D = x.shape
    LD = L * D

    # glue (plain JAX): static slice + lane-dense flatten; pe is cast once so
    # all kernel math stays in x.dtype (bf16-native VPU on v6e/v7x).
    x2 = x.reshape(B, LD)
    pe2 = pe[:L, :].reshape(1, LD).astype(x.dtype)

    tb, tc = _choose_tiles(B, LD, x.dtype.itemsize)
    grid = (pl.cdiv(B, tb), pl.cdiv(LD, tc))

    row_spec = pl.BlockSpec((tb, tc), lambda i, j: (i, j))
    pe_spec = pl.BlockSpec((1, tc), lambda i, j: (0, j))   # resident row, re-used per column chunk
    out_shape = jax.ShapeDtypeStruct((B, LD), x.dtype)
    cparams = pltpu.CompilerParams(
        dimension_semantics=("parallel", "parallel"),
        vmem_limit_bytes=48 * 1024 * 1024,   # v5e's default scoped limit is only 16 MiB
    )

    if (not training) or dropout_p == 0.0:
        out2 = pl.pallas_call(
            _pos_dec_eval_kernel,
            out_shape=out_shape,
            grid=grid,
            in_specs=[row_spec, pe_spec],
            out_specs=row_spec,
            compiler_params=cparams,
        )(x2, pe2)
        return out2.reshape(B, L, D)

    if dropout_p >= 1.0:
        # everything dropped; avoid divide-by-zero in the scale
        return jnp.zeros_like(x)

    if key is None:
        key = jax.random.PRNGKey(0)
    scale = 1.0 / (1.0 - float(dropout_p))

    # Preferred path: on-chip PRNG -> no dropout-bits tensor in HBM at all.
    seed = jax.random.randint(key, (1,), 0, jnp.iinfo(jnp.int32).max, dtype=jnp.int32)
    thr32 = min(int(float(dropout_p) * (1 << 32)), (1 << 32) - 1)
    prng_kernel = functools.partial(_pos_dec_train_prng_kernel,
                                    threshold=thr32, scale=scale)
    try:
        out2 = pl.pallas_call(
            prng_kernel,
            out_shape=out_shape,
            grid=grid,
            in_specs=[
                pl.BlockSpec(memory_space=pltpu.MemorySpace.SMEM),  # seed scalar
                row_spec,
                pe_spec,
            ],
            out_specs=row_spec,
            compiler_params=cparams,
        )(seed, x2, pe2)
        out2 = jax.block_until_ready(out2)
    except Exception:
        # TODO(synk): on-chip PRNG does not lower on some interpret/CPU backends;
        # fall back to host-generated uint8 bits (still 4x less traffic than uint32).
        bits = jax.random.bits(key, (B, LD), dtype=jnp.uint8)
        thr8 = min(int(round(float(dropout_p) * 256.0)), 255)
        bits_kernel = functools.partial(_pos_dec_train_bits_kernel,
                                        threshold=thr8, scale=scale)
        out2 = pl.pallas_call(
            bits_kernel,
            out_shape=out_shape,
            grid=grid,
            in_specs=[row_spec, pe_spec, row_spec],
            out_specs=row_spec,
            compiler_params=cparams,
        )(x2, pe2, bits)

    return out2.reshape(B, L, D)


# ---------------------------------------------------------------------------
# Main
# ---------------------------------------------------------------------------
if __name__ == "__main__":
    B, L, D = 2, 8, 32        # batch, seq, d_model
    MAX_LEN = 100
    P = 0.1

    key = jax.random.PRNGKey(0)
    kx, kdrop = jax.random.split(key)
    x = jax.random.normal(kx, (B, L, D), dtype=jnp.float32)
    pe = make_positional_encoding(D, MAX_LEN)

    ref = x - pe[None, :L, :]

    # eval-mode forward (dropout == identity): deterministic check vs plain JAX
    out = positional_decoding(x, pe, dropout_p=P, training=False)
    out = jax.block_until_ready(out)
    assert out.shape == (B, L, D)
    assert jnp.allclose(out, ref, atol=1e-6, rtol=1e-6)

    # training-mode forward: every element must be 0 or ref/(1-p)
    out_tr = positional_decoding(x, pe, dropout_p=P, training=True, key=kdrop)
    out_tr = jax.block_until_ready(out_tr)
    assert out_tr.shape == (B, L, D)
    scaled = ref / (1.0 - P)
    ok = jnp.logical_or(jnp.isclose(out_tr, 0.0, atol=1e-6),
                        jnp.isclose(out_tr, scaled, atol=1e-5, rtol=1e-5))
    assert bool(jnp.all(ok))

    print("KERNEL_OK")
</pallas_src>

<mosaic_0001>
module attributes {stable_mosaic.version = 11 : i64} {
  func.func @_pos_dec_eval_kernel(%arg0: i32, %arg1: i32, %arg2: memref<2x256xf32, #tpu.memory_space<vmem>>, %arg3: memref<1x256xf32, #tpu.memory_space<vmem>>, %arg4: memref<2x256xf32, #tpu.memory_space<vmem>>) attributes {dimension_semantics = [#tpu.dimension_semantics<parallel>, #tpu.dimension_semantics<parallel>], iteration_bounds = array<i64: 1, 1>, scalar_prefetch = 0 : i64, scratch_operands = 0 : i64, tpu.core_type = #tpu.core_type<tc>, window_params = [{transform_indices = @transform_0, window_bounds = array<i64: 2, 256>}, {transform_indices = @transform_1, window_bounds = array<i64: 1, 256>}, {transform_indices = @transform_2, window_bounds = array<i64: 2, 256>}]} {
    %c0 = arith.constant 0 : index
    %c0_0 = arith.constant 0 : index
    %0 = vector.load %arg2[%c0, %c0_0] : memref<2x256xf32, #tpu.memory_space<vmem>>, vector<2x256xf32>
    %c0_1 = arith.constant 0 : index
    %c0_2 = arith.constant 0 : index
    %1 = vector.load %arg3[%c0_1, %c0_2] : memref<1x256xf32, #tpu.memory_space<vmem>>, vector<1x256xf32>
    %2 = vector.broadcast %1 : vector<1x256xf32> to vector<2x256xf32>
    %3 = arith.subf %0, %2 : vector<2x256xf32>
    %c0_3 = arith.constant 0 : index
    %c0_4 = arith.constant 0 : index
    %4 = vector.load %arg4[%c0_3, %c0_4] : memref<2x256xf32, #tpu.memory_space<vmem>>, vector<2x256xf32>
    tpu.vector_store %arg4[%c0_3, %c0_4], %3 {strides = array<i32>} : memref<2x256xf32, #tpu.memory_space<vmem>>, vector<2x256xf32>,
    return
  }
  func.func @transform_0(%arg0: i32, %arg1: i32) -> (i32, i32) {
    %c0_i32 = arith.constant 0 : i32
    return %arg0, %arg1 : i32, i32
  }
  func.func @transform_1(%arg0: i32, %arg1: i32) -> (i32, i32) {
    %c0_i32 = arith.constant 0 : i32
    %c0_i32_0 = arith.constant 0 : i32
    return %c0_i32, %arg1 : i32, i32
  }
  func.func @transform_2(%arg0: i32, %arg1: i32) -> (i32, i32) {
    %c0_i32 = arith.constant 0 : i32
    return %arg0, %arg1 : i32, i32
  }
}

</mosaic_0001>

<bundles_post_ra>
// kernel: tpu_custom_call.1
= control target key start
LH: loop header
LB: loop body
LE: loop exit
PB: predicated region body
PF: predicated region fallthrough
CT: control target
= control target key end

     0   :  { %7 = vsyncpa [#allocation3], 0  ;;  %s157_s0 = inlined_call_operand.hbm [shape: f32[2,256], index: 0, kind: input, shape index: {}]   ;;  %s158_s1 = inlined_call_operand.vmem [shape: f32[1,256], index: 1, kind: input, shape index: {}]   ;;  %s159_s2 = inlined_call_operand.hbm [shape: f32[2,256], index: 2, kind: output, shape index: {}]  }
   0x1   :  { %8 = vsyncpa [#allocation4], 0  ;;  %s112_s9 = smov [#allocation2]   ;;  %s64_s13 = scalar_lea.hbm %s157_s0, 64 }
   0x2   :  { %s15_s10 = sshll.u32 %s112_s9, 4  ;;  %p65_p0 = scmp.ne.s32.totalorder %s157_s0, %s64_s13  ;;  %s16_s10 = int_to_ptr.vmem [resolvable:$true] %s15_s10 }
   0x3   :  { %p68_p1 = scmp.lt.u32.totalorder %s64_s13, %s157_s0 }
   0x5   :  { %p70_p2 = pnand %p68_p1, %p65_p0 }
   0x7   :  { %73 = shalt.err (!%p70_p2)
}
   0x8   :  { %s74_s18 = scalar_lea.vmem %s16_s10, 64  ;;  %p79_p4 = scmp.lt.s32.totalorder %s16_s10, %s16_s10 }
   0x9   :  { %p75_p3 = scmp.ne.s32.totalorder %s16_s10, %s74_s18  ;;  %p80_p5 = scmp.lt.s32.totalorder %s74_s18, %s74_s18 }
   0xb   :  { %p81_p6 = por %p80_p5, %p79_p4 }
   0xd   :  { %p82_p7 = pnand %p81_p6, %p75_p3 }
   0xf   :  { %85 = shalt.err (!%p82_p7)
}
  0x10   :  { %18 = dma.hbm_to_vmem [thread:$0]  %s157_s0, 64, %s16_s10, [#allocation3]  }
  0x11   :  { %108 = dma.done.wait [#allocation3], 64  }
  0x12   :  { %109 = vsyncadd [#allocation3], 4294967232  ;;  %v27_v0 = vlaneseq  ;;  %v113_v1 = vmov 1983009808   ;;  %v25_v7 = vld [vmem:[%s158_s1] sm:$0x3] }
  0x13   :  { %v37_v2 = vunpack.c.l.s4 %v113_v1  ;;  %v24_v12 = vld [vmem:[#allocation2] sm:$0xf]  ;;  %s114_s23 = smov [#allocation5]  }
  0x14   :  { %v28_v3 = vshrl.u32 %v27_v0, 7  ;;  %s52_s0 = sshll.u32 %s114_s23, 4  ;;  %s53_s0 = int_to_ptr.vmem [resolvable:$true] %s52_s0 }
  0x15   :  { %v38_v6 = vunpack.c.0.s8 %v37_v2  ;;  %s86_s24 = scalar_lea.vmem %s53_s0, 64  ;;  %p91_p9 = scmp.lt.s32.totalorder %s53_s0, %s53_s0 }
  0x16   :  { %v29_v4 = vsub.s32 0, %v28_v3  ;;  %v33_v5 = vsub.s32 1, %v28_v3  ;;  %p87_p8 = scmp.ne.s32.totalorder %s53_s0, %s86_s24  ;;  %p92_p10 = scmp.lt.s32.totalorder %s86_s24, %s86_s24 }
  0x17   :  { %v41_v10 = vsub.s32 %v38_v6, %v28_v3 }
  0x18   :  { %v30_v8 = vrot.slane %v25_v7, %v29_v4  ;;  %v34_v9 = vrot.slane %v25_v7, %v33_v5  ;;  %p93_p11 = por %p92_p10, %p91_p9 }
  0x1a   :  { %v35_v11 = vcombine.low %v30_v8, %v34_v9  ;;  %p94_p12 = pnand %p93_p11, %p87_p8 }
  0x1c   :  { %v42_v13 = vrot.slane %v35_v11, %v41_v10 }
  0x1e   :  { %v44_v14 = vsub.f32 %v24_v12, %v42_v13 }
  0x20   :  { %45 = vst [vmem:[#allocation5] sm:$0xf] %v44_v14 }
  0x21   :  { %97 = shalt.err (!%p94_p12)
}
  0x22   :  { %s98_s26 = scalar_lea.hbm %s159_s2, 64 }
  0x23   :  { %p99_p13 = scmp.ne.s32.totalorder %s159_s2, %s98_s26  ;;  %p102_p0 = scmp.lt.u32.totalorder %s98_s26, %s159_s2 }
  0x25   :  { %p104_p1 = pnand %p102_p0, %p99_p13 }
  0x27   :  { %107 = shalt.err (!%p104_p1)
}
  0x28   :  { %55 = dma.vmem_to_hbm [thread:$0]  %s53_s0, 64, %s159_s2, [#allocation4]  }
  0x29   :  { %110 = dma.done.wait [#allocation4], 64  }
  0x2a   :  { %111 = vsyncadd [#allocation4], 4294967232 }
  0x2b   :  { %59 = vsyncpa [#allocation3], 1 }
  0x2c   :  { %60 = vsyncpa [#allocation4], 1 }

</bundles_post_ra>
